<compile_context>
chip_gen: v5e
topology: v5e:2x2
jax: 0.10.0
libtpu: 0.0.40
codegen_flags: <defaults>
</compile_context>

<pallas_src>
import functools

import jax
import jax.numpy as jnp
from jax.experimental import pallas as pl
from jax.experimental.pallas import tpu as pltpu


def _patch_embed_kernel(x_ref, w_ref, b_ref, o_ref):
    # x_ref: (tm, K) bf16 patch tile, w_ref: (K, tn) bf16 weight tile,
    # b_ref: (1, tn) f32 bias.  One MXU matmul per grid step with f32
    # accumulation; bias added on the f32 accumulator, then cast to out dtype.
    acc = jnp.dot(x_ref[...], w_ref[...], preferred_element_type=jnp.float32)
    o_ref[...] = (acc + b_ref[...]).astype(o_ref.dtype)


def _vmem_budget_bytes():
    """Generation-aware scoped-VMEM ceiling with headroom.

    v5e/v6e: 128 MiB physical -> ~96 MiB budget.
    v7x:      64 MiB physical -> ~48 MiB budget (room for compiler scratch,
              semaphores, double buffers).
    Falls back to 64 MiB if the hardware query is unavailable.
    """
    default = 64 * 1024 * 1024
    try:
        info = pltpu.get_tpu_info()
        cap = getattr(info, "vmem_capacity_bytes", None)
        if not cap:
            return default
        return int(min(cap * 3 // 4, 112 * 1024 * 1024))
    except Exception:  # pragma: no cover - conservative fallback
        return default


def patch_embed(x, weight, bias, patch_size, *, compute_dtype=jnp.bfloat16):
    """ViT patch embedding.

    x:      (B, C, H, W)           NCHW activations (PyTorch layout)
    weight: (embed_dim, C, p, p)   PyTorch Conv2d weight
    bias:   (embed_dim,)
    Returns (B, num_patches, embed_dim) in x.dtype.
    """
    B, C, H, W = x.shape
    p = int(patch_size)
    assert H % p == 0 and W % p == 0, "image size must be divisible by patch size"
    gh, gw = H // p, W // p
    num_patches = gh * gw
    embed_dim = weight.shape[0]
    K = C * p * p
    M, N = B * num_patches, embed_dim
    out_dtype = x.dtype

    # --- im2col (XLA side, fused into the Pallas input DMA when possible) ---
    # (B, C, gh, p, gw, p) -> (B, gh, gw, C, p, p) -> (M, K); column order
    # (C, ph, pw) matches PyTorch Conv2d weight flattening.
    patches = x.reshape(B, C, gh, p, gw, p)
    patches = jnp.transpose(patches, (0, 2, 4, 1, 3, 5)).reshape(M, K)
    w_mat = weight.reshape(embed_dim, K).T           # (K, N)

    # bf16 operands for the MXU; bias stays f32 (added on the f32 accumulator).
    patches = patches.astype(compute_dtype)
    w_mat = w_mat.astype(compute_dtype)
    b_mat = bias.astype(jnp.float32).reshape(1, N)

    # --- Zero-padding for clean (8,128)/MXU tiles ----------------------------
    # K: pad to a 128-multiple when unaligned (e.g. p=14 -> K=588 -> 640);
    #    small K (<128) stays a full-extent (legal) block.
    # M: pad to a sublane multiple of 8 (e.g. 196 patches at batch 1).
    K_pad = K if (K <= 128 or K % 128 == 0) else ((K + 127) // 128) * 128
    M_pad = ((M + 7) // 8) * 8
    if K_pad != K:
        patches = jnp.pad(patches, ((0, 0), (0, K_pad - K)))
        w_mat = jnp.pad(w_mat, ((0, K_pad - K), (0, 0)))
    if M_pad != M:
        patches = jnp.pad(patches, ((0, M_pad - M), (0, 0)))

    # --- Tile selection ------------------------------------------------------
    # M axis: 512-row tiles, but always >= 2 grid steps when M > 128 so both
    # v7x TensorCores get work and the DMA/compute pipeline has depth.
    if M_pad > 512:
        tm = 512
    elif M_pad > 256:
        tm = 256
    elif M_pad > 128:
        tm = 128
    else:
        tm = M_pad
    # N axis: whole embed_dim as one lane-dense tile up to 2048 -> the (K, N)
    # weight tile (a few MiB in bf16) is DMA'd once and stays VMEM-resident
    # across the whole patch stream.  Wider than 2048 falls back to 1024
    # (128-multiple); weight then re-streams along N (rare for ViT).
    tn = N if N <= 2048 else 1024

    grid = (pl.cdiv(M_pad, tm), pl.cdiv(N, tn))

    # --- VMEM budget (double-buffered tiles, clamped to the chip budget) ----
    in_elt = jnp.dtype(compute_dtype).itemsize
    out_elt = jnp.dtype(out_dtype).itemsize
    tile_bytes = 2 * (in_elt * (tm * K_pad + K_pad * tn)
                      + 4 * tn
                      + out_elt * tm * tn)
    vmem_limit = int(min(_vmem_budget_bytes(),
                         max(2 * tile_bytes, 32 * 1024 * 1024)))

    cost = pl.CostEstimate(
        flops=2 * M * N * K,
        transcendentals=0,
        bytes_accessed=in_elt * (M * K + K * N) + out_elt * M * N + 4 * N,
    )

    out = pl.pallas_call(
        _patch_embed_kernel,
        out_shape=jax.ShapeDtypeStruct((M_pad, N), out_dtype),
        grid_spec=pltpu.PrefetchScalarGridSpec(
            num_scalar_prefetch=0,
            grid=grid,
            in_specs=[
                pl.BlockSpec((tm, K_pad), lambda i, j: (i, 0)),
                # Block index constant along the M axis -> weight / bias tiles
                # stay resident in VMEM (no re-fetch per patch tile).
                # (pipeline_mode=pl.Buffered(1) would also drop their second
                # buffer; left at the default for compatibility.)
                pl.BlockSpec((K_pad, tn), lambda i, j: (0, j)),
                pl.BlockSpec((1, tn), lambda i, j: (0, j)),
            ],
            out_specs=pl.BlockSpec((tm, tn), lambda i, j: (i, j)),
        ),
        compiler_params=pltpu.CompilerParams(
            dimension_semantics=("parallel", "parallel"),
            vmem_limit_bytes=vmem_limit,
            # Let XLA fuse the im2col permutation / cast / pad into the patch
            # operand's input DMA (removes an HBM round trip of activations).
            allow_input_fusion=[True, False, False],
        ),
        cost_estimate=cost,
    )(patches, w_mat, b_mat)

    if M_pad != M:
        out = out[:M]
    # norm_layer defaults to Identity in the reference module.
    return out.reshape(B, num_patches, embed_dim)


if __name__ == "__main__":
    # Small shapes consistent with the module: img_size=16, patch_size=4,
    # in_c=4, embed_dim=32, batch=2  ->  num_patches = (16/4)^2 = 16.
    B, C, H, W = 2, 4, 16, 16
    patch_size = 4
    embed_dim = 32

    key = jax.random.PRNGKey(0)
    kx, kw, kb = jax.random.split(key, 3)

    x = jax.random.normal(kx, (B, C, H, W), dtype=jnp.float32)
    weight = jax.random.normal(
        kw, (embed_dim, C, patch_size, patch_size), dtype=jnp.float32) * 0.02
    bias = jax.random.normal(kb, (embed_dim,), dtype=jnp.float32) * 0.02

    fn = jax.jit(functools.partial(patch_embed, patch_size=patch_size))
    out = fn(x, weight, bias)
    jax.block_until_ready(out)
    assert out.shape == (B, (H // patch_size) * (W // patch_size), embed_dim)

    # --- References ----------------------------------------------------------
    gh = gw = H // patch_size
    K = C * patch_size * patch_size
    ref_patches = jnp.transpose(
        x.reshape(B, C, gh, patch_size, gw, patch_size),
        (0, 2, 4, 1, 3, 5)).reshape(B, gh * gw, K)
    w_flat = weight.reshape(embed_dim, K)

    # (1) Same-precision reference: bf16 operands, f32 accumulation
    #     (mirrors the kernel's MXU path) -> tight tolerance.
    ref_bf16 = jnp.einsum(
        "bpk,ek->bpe",
        ref_patches.astype(jnp.bfloat16).astype(jnp.float32),
        w_flat.astype(jnp.bfloat16).astype(jnp.float32),
        precision=jax.lax.Precision.HIGHEST) + bias
    assert jnp.allclose(out, ref_bf16, atol=1e-4, rtol=1e-3), (
        "max diff vs bf16 reference: "
        f"{float(jnp.max(jnp.abs(out - ref_bf16)))}")

    # (2) Full-f32 reference: loose tolerance (bf16 MXU inputs by design).
    ref_f32 = jnp.einsum("bpk,ek->bpe", ref_patches, w_flat,
                         precision=jax.lax.Precision.HIGHEST) + bias
    assert jnp.allclose(out, ref_f32, atol=1e-2, rtol=1e-2), (
        "max diff vs f32 reference: "
        f"{float(jnp.max(jnp.abs(out - ref_f32)))}")

    print("KERNEL_OK")
</pallas_src>

<mosaic_0001>
module attributes {stable_mosaic.version = 11 : i64} {
  func.func @_patch_embed_kernel(%arg0: i32, %arg1: i32, %arg2: memref<32x64xbf16, #tpu.memory_space<vmem>>, %arg3: memref<64x32xbf16, #tpu.memory_space<vmem>>, %arg4: memref<1x32xf32, #tpu.memory_space<vmem>>, %arg5: memref<32x32xf32, #tpu.memory_space<vmem>>) attributes {dimension_semantics = [#tpu.dimension_semantics<parallel>, #tpu.dimension_semantics<parallel>], iteration_bounds = array<i64: 1, 1>, scalar_prefetch = 0 : i64, scratch_operands = 0 : i64, tpu.core_type = #tpu.core_type<tc>, window_params = [{transform_indices = @transform_0, window_bounds = array<i64: 32, 64>}, {transform_indices = @transform_1, window_bounds = array<i64: 64, 32>}, {transform_indices = @transform_2, window_bounds = array<i64: 1, 32>}, {transform_indices = @transform_3, window_bounds = array<i64: 32, 32>}]} {
    %c0 = arith.constant 0 : index
    %c0_0 = arith.constant 0 : index
    %0 = vector.load %arg2[%c0, %c0_0] : memref<32x64xbf16, #tpu.memory_space<vmem>>, vector<32x64xbf16>
    %c0_1 = arith.constant 0 : index
    %c0_2 = arith.constant 0 : index
    %1 = vector.load %arg3[%c0_1, %c0_2] : memref<64x32xbf16, #tpu.memory_space<vmem>>, vector<64x32xbf16>
    %cst = arith.constant dense<0.000000e+00> : vector<32x32xf32>
    %2 = tpu.matmul %0, %1, %cst {dimension_numbers = #tpu.dot_dimension_numbers<[1], [0], [0], [1], [0, 0, 1, 1], [], []>} : vector<32x64xbf16>, vector<64x32xbf16>, vector<32x32xf32> -> vector<32x32xf32>
    %c0_3 = arith.constant 0 : index
    %c0_4 = arith.constant 0 : index
    %3 = vector.load %arg4[%c0_3, %c0_4] : memref<1x32xf32, #tpu.memory_space<vmem>>, vector<1x32xf32>
    %4 = vector.broadcast %3 : vector<1x32xf32> to vector<32x32xf32>
    %5 = arith.addf %2, %4 : vector<32x32xf32>
    %c0_5 = arith.constant 0 : index
    %c0_6 = arith.constant 0 : index
    %6 = vector.load %arg5[%c0_5, %c0_6] : memref<32x32xf32, #tpu.memory_space<vmem>>, vector<32x32xf32>
    tpu.vector_store %arg5[%c0_5, %c0_6], %5 {strides = array<i32>} : memref<32x32xf32, #tpu.memory_space<vmem>>, vector<32x32xf32>,
    return
  }
  func.func @transform_0(%arg0: i32, %arg1: i32) -> (i32, i32) {
    %c0_i32 = arith.constant 0 : i32
    %c0_i32_0 = arith.constant 0 : i32
    return %arg0, %c0_i32 : i32, i32
  }
  func.func @transform_1(%arg0: i32, %arg1: i32) -> (i32, i32) {
    %c0_i32 = arith.constant 0 : i32
    %c0_i32_0 = arith.constant 0 : i32
    return %c0_i32, %arg1 : i32, i32
  }
  func.func @transform_2(%arg0: i32, %arg1: i32) -> (i32, i32) {
    %c0_i32 = arith.constant 0 : i32
    %c0_i32_0 = arith.constant 0 : i32
    return %c0_i32, %arg1 : i32, i32
  }
  func.func @transform_3(%arg0: i32, %arg1: i32) -> (i32, i32) {
    %c0_i32 = arith.constant 0 : i32
    return %arg0, %arg1 : i32, i32
  }
}

</mosaic_0001>

<bundles_post_ra>
// kernel: patch_embed.1
= control target key start
LH: loop header
LB: loop body
LE: loop exit
PB: predicated region body
PF: predicated region fallthrough
CT: control target
= control target key end

     0   :  { %s232_s0 = inlined_call_operand.vmem [shape: bf16[32,64], index: 0, kind: input, shape index: {}]   ;;  %s233_s1 = inlined_call_operand.vmem [shape: bf16[64,32], index: 1, kind: input, shape index: {}]   ;;  %s234_s2 = inlined_call_operand.vmem [shape: f32[1,32], index: 2, kind: input, shape index: {}]   ;;  %s235_s3 = inlined_call_operand.hbm [shape: f32[32,32], index: 3, kind: output, shape index: {}]  }
   0x1   :  { %v146_v0 = vld [vmem:[%s233_s1 + $0x18] sm:$0xff]  ;;  %v145_v1 = vld [vmem:[%s233_s1 + $0x10] sm:$0xff] }
   0x2   :  { %77 = vmatpush.bf16.msra.mxu0 %v146_v0  ;;  %147 = vmatpush.bf16.msra.mxu1 %v146_v0 }
   0x3   :  { %8 = vsyncpa [#allocation3], 0  ;;  %v144_v2 = vld [vmem:[%s233_s1 + $0x8] sm:$0xff]  ;;  %v143_v3 = vld [vmem:[%s233_s1] sm:$0xff]  ;;  %vm66_vm0 = vcmask 523264   ;;  %vm92_vm1 = vcmask 261120  }
   0x4   :  { %v141_v4 = vld [vmem:[%s232_s0] sm:$0xff]  ;;  %v142_v5 = vld [vmem:[%s232_s0 + $0x8] sm:$0xff]  ;;  %s181_s1 = smov [#allocation2]   ;;  %s103_s28 = sshll.u32 %s235_s3, 4  ;;  %s104_s28 = int_to_ptr.hbm [resolvable:$true] %s103_s28 }
   0x5   :  { %v154_v6 = vld [vmem:[%s234_s2] ss:$0 sm:$0xff]  ;;  %s101_s0 = sshll.u32 %s181_s1, 4  ;;  %s182_s2 = smov 128   ;;  %s102_s0 = int_to_ptr.vmem [resolvable:$true] %s101_s0 }
   0x6   :  { %78 = vmatpush.bf16.msra.mxu0 %v145_v1  ;;  %148 = vmatpush.bf16.msra.mxu1 %v145_v1  ;;  %s183_s29 = smov 8  }
   0xa   :  { %79 = vmatpush.bf16.msra.mxu0 %v144_v2  ;;  %149 = vmatpush.bf16.msra.mxu1 %v144_v2 }
   0xe   :  { %80 = vmatpush.bf16.msra.mxu0 %v143_v3  ;;  %150 = vmatpush.bf16.msra.mxu1 %v143_v3 }
  0x11   :  { %139 = vmatmul.msk.bf16.vlgmr.msra.gmra.mxu0 %vm66_vm0, %v141_v4  ;;  %140 = vmatmul.msk.bf16.vlgmr.msra.gmra.mxu1 %vm66_vm0, %v142_v5 }
  0x8e   :  { %v82_v7 = vpop.f32.mrf.mxu0  ;;  %v87_v8 = vpop.f32.mrf.mxu1 }
  0x8f   :  { %v83_v9 = vadd.f32 %v154_v6, %v82_v7  ;;  %v88_v10 = vadd.f32 %v154_v6, %v87_v8 }
  0x91   :  { %93 = vst.msk [vmem:[#allocation2] sm:$0xff] %vm92_vm1, %v83_v9 }
  0x92   :  { %95 = vst.msk [vmem:[#allocation2 + $0x10] sm:$0xff] %vm92_vm1, %v88_v10 }
  0x96   :  { %v84_v11 = vpop.f32.mrf.mxu0  ;;  %v89_v12 = vpop.f32.mrf.mxu1 }
  0x97   :  { %v85_v13 = vadd.f32 %v154_v6, %v84_v11  ;;  %v90_v14 = vadd.f32 %v154_v6, %v89_v12 }
  0x99   :  { %94 = vst.msk [vmem:[#allocation2 + $0x8] sm:$0xff] %vm92_vm1, %v85_v13 }
  0x9a   :  { %96 = vst.msk [vmem:[#allocation2 + $0x18] sm:$0xff] %vm92_vm1, %v90_v14 }
  0x9b   :  { %109 = dma.vmem_to_hbm [thread:$0]  %s102_s0, 512, %s104_s28, [#allocation3], %s182_s2, %s182_s2, %s183_s29  }
  0x9c   :  { %179 = dma.done.wait [#allocation3], 512  }
  0x9d   :  { %180 = vsyncadd [#allocation3], 4294966784 }
  0x9e   :  { %114 = vsyncpa [#allocation3], 1 }

</bundles_post_ra>
